<compile_context>
chip_gen: v7x
topology: tpu7x:2x2x1
jax: 0.10.0
libtpu: 0.0.40
codegen_flags: <defaults>
</compile_context>

<pallas_src>
import functools

import jax
import jax.numpy as jnp
from jax.experimental import pallas as pl
from jax.experimental.pallas import tpu as pltpu


# VMEM budget (bytes) for the double-buffered x + out blocks; kept well under
# the smallest scoped-VMEM default (v5e: 16 MiB) with explicit headroom.
_VMEM_BLOCK_BUDGET = 20 << 20


def _mlp_kernel(x_ref, w1_ref, b1_ref, w2_ref, b2_ref, o_ref, *, bb, mxu_dtype):
    """One (batch-block, token-tile) grid step.

    x_ref : [Bb, D, tile]  (native x dtype)
    w1_ref: [H, D], w2_ref: [H, H]  (native param dtype)
    b1_ref, b2_ref: [H, 1] f32
    o_ref : [Bb, D, tile]  (out dtype)     -- requires D == H (residual)
    """
    # Weights are hoisted + cast once per grid step (tiny, stay in vregs).
    w1 = w1_ref[...].astype(mxu_dtype)
    w2 = w2_ref[...].astype(mxu_dtype)
    b1 = b1_ref[...]
    b2 = b2_ref[...]
    for b in range(bb):                                   # static unroll over Bb
        x = x_ref[b]                                      # [D, tile], native dtype
        x32 = x.astype(jnp.float32)
        h = jnp.dot(w1, x.astype(mxu_dtype),
                    preferred_element_type=jnp.float32)   # [H, tile] f32
        h = jnp.maximum(h + b1, 0.0)                      # bias + ReLU
        # Dropout(p=0.15) -> identity (inference mode).
        o = jnp.dot(w2, h.astype(mxu_dtype),
                    preferred_element_type=jnp.float32)   # [H, tile] f32
        o = o + b2 + x32                                  # bias + residual (f32)
        o_ref[b] = o.astype(o_ref.dtype)


def multilayer_perceptron(x, params, *, tn=8192, out_dtype=None,
                          mxu_dtype=jnp.bfloat16):
    """Forward pass matching the PyTorch module (inference-mode dropout).

    x: [B, D, N, W] (NCHW input of the 1x1 convs) or [B, D, N].
    params: dict with conv weights in PyTorch layout:
        w1: [H, D, 1, 1], b1: [H], w2: [H, H, 1, 1], b2: [H]
    tn: max spatial tokens (lane axis) per grid step (further VMEM-capped).
    out_dtype: output dtype (default: x.dtype). bf16 halves write traffic.
    mxu_dtype: dtype fed to the MXU (f32 accumulation either way).
    """
    squeeze_w = False
    if x.ndim == 3:                       # docstring shape [B, D, N]
        x = x[..., None]
        squeeze_w = True
    B, D, N, W = x.shape
    H = params["w1"].shape[0]
    assert D == H, "residual connection requires input_dim == hidden_dim"

    out_dtype = x.dtype if out_dtype is None else out_dtype
    NW = N * W

    # Free reshape (contiguous trailing dims): channels on sublanes, tokens on
    # lanes. No transposes, no padding, no dtype-conversion HBM passes.
    xt = x.reshape(B, D, NW)
    w1 = params["w1"].reshape(H, D)
    w2 = params["w2"].reshape(H, H)
    b1 = params["b1"].astype(jnp.float32).reshape(H, 1)
    b2 = params["b2"].astype(jnp.float32).reshape(H, 1)

    # --- Tile / batch-block selection under a VMEM budget ------------------
    x_isz = x.dtype.itemsize
    o_isz = jnp.dtype(out_dtype).itemsize
    bytes_per_token = D * (x_isz + o_isz) * 2            # double-buffered in+out
    max_tokens = max(128, _VMEM_BLOCK_BUDGET // bytes_per_token)
    tokens_per_step = max(1, min(tn, max_tokens))

    if NW <= tokens_per_step:
        tile = NW                                         # full token axis
        bb = max(1, min(B, tokens_per_step // max(NW, 1), 8))
        if B > 1:                                         # keep >=2 batch blocks
            bb = min(bb, -(-B // 2))                      # (v7x two-TC sharding)
    else:
        tile = max(128, (tokens_per_step // 128) * 128)   # lane-dense tile
        bb = 1
    grid = (pl.cdiv(B, bb), pl.cdiv(NW, tile))            # ragged blocks masked

    # Explicit scoped-VMEM limit (>= what we use, <= 32 MiB: safe on v5e..v7x).
    w_bytes = (w1.size * w1.dtype.itemsize + w2.size * w2.dtype.itemsize
               + (b1.size + b2.size) * 4)
    needed = 2 * (bb * D * tile * (x_isz + o_isz) + w_bytes)
    vmem_limit = int(min(32 << 20, max(needed + (2 << 20), 16 << 20)))

    cost = pl.CostEstimate(
        flops=4 * B * NW * D * H,                          # two matmuls
        transcendentals=0,
        bytes_accessed=B * NW * D * (x_isz + o_isz) + w_bytes)

    kernel = functools.partial(_mlp_kernel, bb=bb, mxu_dtype=mxu_dtype)

    out = pl.pallas_call(
        kernel,
        out_shape=jax.ShapeDtypeStruct((B, D, NW), out_dtype),
        grid_spec=pltpu.PrefetchScalarGridSpec(
            num_scalar_prefetch=0,
            grid=grid,
            in_specs=[
                pl.BlockSpec((bb, D, tile), lambda i, j: (i, 0, j)),  # x block
                pl.BlockSpec((H, D), lambda i, j: (0, 0)),            # W1 (full)
                pl.BlockSpec((H, 1), lambda i, j: (0, 0)),            # b1
                pl.BlockSpec((H, H), lambda i, j: (0, 0)),            # W2 (full)
                pl.BlockSpec((H, 1), lambda i, j: (0, 0)),            # b2
            ],
            out_specs=pl.BlockSpec((bb, D, tile), lambda i, j: (i, 0, j)),
        ),
        compiler_params=pltpu.CompilerParams(
            dimension_semantics=("parallel", "parallel"),
            vmem_limit_bytes=vmem_limit),
        cost_estimate=cost,
    )(xt, w1, b1, w2, b2)

    out = out.reshape(B, D, N, W)
    if squeeze_w:
        out = out[..., 0]
    return out


def init_params(key, input_dim, hidden_dim, dtype=jnp.float32):
    """Deterministic init mimicking PyTorch Conv2d default (kaiming uniform)."""
    k1, k2, k3, k4 = jax.random.split(key, 4)
    bound1 = 1.0 / (input_dim ** 0.5)     # fan_in = input_dim * 1 * 1
    bound2 = 1.0 / (hidden_dim ** 0.5)
    return {
        "w1": jax.random.uniform(k1, (hidden_dim, input_dim, 1, 1),
                                 dtype, -bound1, bound1),
        "b1": jax.random.uniform(k2, (hidden_dim,), dtype, -bound1, bound1),
        "w2": jax.random.uniform(k3, (hidden_dim, hidden_dim, 1, 1),
                                 dtype, -bound2, bound2),
        "b2": jax.random.uniform(k4, (hidden_dim,), dtype, -bound2, bound2),
    }


def _reference(x_nchw, params, mxu_dtype=jnp.bfloat16):
    """Pure-JAX reference mirroring the kernel math (inference-mode dropout)."""
    B, D, N, W = x_nchw.shape
    H = params["w1"].shape[0]
    x = x_nchw.reshape(B, D, N * W).astype(jnp.float32)
    w1 = params["w1"].reshape(H, D)
    w2 = params["w2"].reshape(H, H)
    h = jnp.einsum("hd,bdt->bht", w1.astype(mxu_dtype), x.astype(mxu_dtype),
                   preferred_element_type=jnp.float32)
    h = jnp.maximum(h + params["b1"].astype(jnp.float32).reshape(1, H, 1), 0.0)
    o = jnp.einsum("hk,bkt->bht", w2.astype(mxu_dtype), h.astype(mxu_dtype),
                   preferred_element_type=jnp.float32)
    o = o + params["b2"].astype(jnp.float32).reshape(1, H, 1) + x
    return o.reshape(B, D, N, W)


if __name__ == "__main__":
    key = jax.random.PRNGKey(0)
    k_x, k_x2, k_p = jax.random.split(key, 3)

    # STID uses NCHW input [B, D, N, 1]; residual requires hidden_dim == D.
    B, D, N, W = 2, 32, 16, 1
    params = init_params(k_p, D, D)

    # --- small shape, f32 in/out: tight check vs matched-precision ref -----
    x = jax.random.normal(k_x, (B, D, N, W), dtype=jnp.float32)
    out = jax.block_until_ready(multilayer_perceptron(x, params))
    assert out.shape == x.shape and out.dtype == x.dtype
    ref = _reference(x, params, mxu_dtype=jnp.bfloat16)
    assert jnp.allclose(out, ref, atol=1e-3, rtol=1e-3), "mismatch (matched ref)"
    ref32 = _reference(x, params, mxu_dtype=jnp.float32)
    assert jnp.allclose(out, ref32, atol=3e-2, rtol=3e-2), "mismatch (f32 ref)"

    # --- larger: ragged token grid + batch blocking + bf16 writeback -------
    B2, N2 = 4, 1000                      # NW=1000 -> tiles of 512, ragged last
    x2 = jax.random.normal(k_x2, (B2, D, N2, W), dtype=jnp.float32)
    out2 = jax.block_until_ready(
        multilayer_perceptron(x2, params, tn=512, out_dtype=jnp.bfloat16))
    assert out2.shape == x2.shape and out2.dtype == jnp.bfloat16
    ref2 = _reference(x2, params, mxu_dtype=jnp.bfloat16)
    assert jnp.allclose(out2.astype(jnp.float32), ref2, atol=3e-2, rtol=3e-2), \
        "bf16-out mismatch vs reference"

    print("KERNEL_OK")
</pallas_src>

<mosaic_0001>
module attributes {stable_mosaic.version = 11 : i64} {
  func.func @_mlp_kernel(%arg0: i32, %arg1: i32, %arg2: memref<1x32x16xf32, #tpu.memory_space<vmem>>, %arg3: memref<32x32xf32, #tpu.memory_space<vmem>>, %arg4: memref<32x1xf32, #tpu.memory_space<vmem>>, %arg5: memref<32x32xf32, #tpu.memory_space<vmem>>, %arg6: memref<32x1xf32, #tpu.memory_space<vmem>>, %arg7: memref<1x32x16xf32, #tpu.memory_space<vmem>>) attributes {dimension_semantics = [#tpu.dimension_semantics<parallel>, #tpu.dimension_semantics<parallel>], iteration_bounds = array<i64: 2, 1>, scalar_prefetch = 0 : i64, scratch_operands = 0 : i64, tpu.core_type = #tpu.core_type<tc>, window_params = [{transform_indices = @transform_0, window_bounds = array<i64: 1, 32, 16>}, {pipeline_mode = #tpu.pipeline_mode<synchronous>, transform_indices = @transform_1, window_bounds = array<i64: 32, 32>}, {pipeline_mode = #tpu.pipeline_mode<synchronous>, transform_indices = @transform_2, window_bounds = array<i64: 32, 1>}, {pipeline_mode = #tpu.pipeline_mode<synchronous>, transform_indices = @transform_3, window_bounds = array<i64: 32, 32>}, {pipeline_mode = #tpu.pipeline_mode<synchronous>, transform_indices = @transform_4, window_bounds = array<i64: 32, 1>}, {transform_indices = @transform_5, window_bounds = array<i64: 1, 32, 16>}]} {
    %c0 = arith.constant 0 : index
    %c0_0 = arith.constant 0 : index
    %0 = vector.load %arg3[%c0, %c0_0] : memref<32x32xf32, #tpu.memory_space<vmem>>, vector<32x32xf32>
    %1 = arith.truncf %0 : vector<32x32xf32> to vector<32x32xbf16>
    %c0_1 = arith.constant 0 : index
    %c0_2 = arith.constant 0 : index
    %2 = vector.load %arg5[%c0_1, %c0_2] : memref<32x32xf32, #tpu.memory_space<vmem>>, vector<32x32xf32>
    %3 = arith.truncf %2 : vector<32x32xf32> to vector<32x32xbf16>
    %c0_3 = arith.constant 0 : index
    %c0_4 = arith.constant 0 : index
    %4 = vector.load %arg4[%c0_3, %c0_4] : memref<32x1xf32, #tpu.memory_space<vmem>>, vector<32x1xf32>
    %c0_5 = arith.constant 0 : index
    %c0_6 = arith.constant 0 : index
    %5 = vector.load %arg6[%c0_5, %c0_6] : memref<32x1xf32, #tpu.memory_space<vmem>>, vector<32x1xf32>
    %c0_7 = arith.constant 0 : index
    %c0_8 = arith.constant 0 : index
    %c0_9 = arith.constant 0 : index
    %6 = vector.load %arg2[%c0_7, %c0_8, %c0_9] : memref<1x32x16xf32, #tpu.memory_space<vmem>>, vector<1x32x16xf32>
    %7 = vector.shape_cast %6 : vector<1x32x16xf32> to vector<32x16xf32>
    %8 = arith.truncf %7 : vector<32x16xf32> to vector<32x16xbf16>
    %cst = arith.constant dense<0.000000e+00> : vector<32x16xf32>
    %9 = tpu.matmul %1, %8, %cst {dimension_numbers = #tpu.dot_dimension_numbers<[1], [0], [0], [1], [0, 0, 1, 1], [], []>} : vector<32x32xbf16>, vector<32x16xbf16>, vector<32x16xf32> -> vector<32x16xf32>
    %10 = vector.broadcast %4 : vector<32x1xf32> to vector<32x16xf32>
    %11 = arith.addf %9, %10 : vector<32x16xf32>
    %cst_10 = arith.constant 0.000000e+00 : f32
    %12 = vector.broadcast %cst_10 : f32 to vector<32x16xf32>
    %13 = arith.maximumf %11, %12 : vector<32x16xf32>
    %14 = arith.truncf %13 : vector<32x16xf32> to vector<32x16xbf16>
    %cst_11 = arith.constant dense<0.000000e+00> : vector<32x16xf32>
    %15 = tpu.matmul %3, %14, %cst_11 {dimension_numbers = #tpu.dot_dimension_numbers<[1], [0], [0], [1], [0, 0, 1, 1], [], []>} : vector<32x32xbf16>, vector<32x16xbf16>, vector<32x16xf32> -> vector<32x16xf32>
    %16 = vector.broadcast %5 : vector<32x1xf32> to vector<32x16xf32>
    %17 = arith.addf %15, %16 : vector<32x16xf32>
    %18 = arith.addf %17, %7 : vector<32x16xf32>
    %c0_12 = arith.constant 0 : index
    %c0_13 = arith.constant 0 : index
    %c0_14 = arith.constant 0 : index
    %19 = vector.load %arg7[%c0_12, %c0_13, %c0_14] : memref<1x32x16xf32, #tpu.memory_space<vmem>>, vector<1x32x16xf32>
    %20 = vector.shape_cast %19 : vector<1x32x16xf32> to vector<32x16xf32>
    %21 = vector.shape_cast %18 : vector<32x16xf32> to vector<1x32x16xf32>
    tpu.vector_store %arg7[%c0_12, %c0_13, %c0_14], %21 {strides = array<i32>} : memref<1x32x16xf32, #tpu.memory_space<vmem>>, vector<1x32x16xf32>,
    return
  }
  func.func @transform_0(%arg0: i32, %arg1: i32) -> (i32, i32, i32) {
    %c0_i32 = arith.constant 0 : i32
    %c0_i32_0 = arith.constant 0 : i32
    return %arg0, %c0_i32, %arg1 : i32, i32, i32
  }
  func.func @transform_1(%arg0: i32, %arg1: i32) -> (i32, i32) {
    %c0_i32 = arith.constant 0 : i32
    %c0_i32_0 = arith.constant 0 : i32
    %c0_i32_1 = arith.constant 0 : i32
    return %c0_i32, %c0_i32_0 : i32, i32
  }
  func.func @transform_2(%arg0: i32, %arg1: i32) -> (i32, i32) {
    %c0_i32 = arith.constant 0 : i32
    %c0_i32_0 = arith.constant 0 : i32
    %c0_i32_1 = arith.constant 0 : i32
    return %c0_i32, %c0_i32_0 : i32, i32
  }
  func.func @transform_3(%arg0: i32, %arg1: i32) -> (i32, i32) {
    %c0_i32 = arith.constant 0 : i32
    %c0_i32_0 = arith.constant 0 : i32
    %c0_i32_1 = arith.constant 0 : i32
    return %c0_i32, %c0_i32_0 : i32, i32
  }
  func.func @transform_4(%arg0: i32, %arg1: i32) -> (i32, i32) {
    %c0_i32 = arith.constant 0 : i32
    %c0_i32_0 = arith.constant 0 : i32
    %c0_i32_1 = arith.constant 0 : i32
    return %c0_i32, %c0_i32_0 : i32, i32
  }
  func.func @transform_5(%arg0: i32, %arg1: i32) -> (i32, i32, i32) {
    %c0_i32 = arith.constant 0 : i32
    %c0_i32_0 = arith.constant 0 : i32
    return %arg0, %c0_i32, %arg1 : i32, i32, i32
  }
}

</mosaic_0001>

<bundles_post_ra>
// kernel: tpu_custom_call.1
= control target key start
LH: loop header
LB: loop body
LE: loop exit
PB: predicated region body
PF: predicated region fallthrough
CT: control target
= control target key end

     0   :  { %s655_s18 = smov 0   ;;  %s657_s19 = smov 0   ;;  %s763_s0 = inlined_call_operand.vmem [shape: f32[2,32,16], index: 0, kind: input, shape index: {}]   ;;  %s764_s1 = inlined_call_operand.vmem [shape: f32[32,32], index: 1, kind: input, shape index: {}]   ;;  %s765_s2 = inlined_call_operand.vmem [shape: f32[32,1], index: 2, kind: input, shape index: {}]   ;;  %s766_s3 = inlined_call_operand.vmem [shape: f32[32,32], index: 3, kind: input, shape index: {}]   ;;  %s767_s4 = inlined_call_operand.vmem [shape: f32[32,1], index: 4, kind: input, shape index: {}]   ;;  %s768_s5 = inlined_call_operand.vmem [shape: f32[2,32,16], index: 5, kind: output, shape index: {}]  }
   0x1   :  { %s659_s20 = smov 0  }
   0x2 LB: > { %s27_s21 = sadd.s32 1, %s618_s19  ;;  %p536_p0 = scmp.ge.s32.totalorder %s622_s20, 1  ;;  %s622_s20 = sphi %s659_s20, %s15_s20   ;;  %s618_s19 = sphi %s657_s19, %s770_s19   ;;  %s614_s18 = sphi %s655_s18, %s769_s18  }
   0x3   : > { %p29_p1 = scmp.ge.s32.totalorder %s27_s21, 2  ;;  %p206_p2 = scmp.lt.s32.totalorder %s622_s20, 3 }
   0x5   : > { %s772_s21 = smov (%p29_p1, %s27_s21), 0  ;;  %p207_p3 = pnand %p536_p0, %p206_p2 }
   0x6   : > { %p240_p4 = scmp.lt.s32.totalorder (!%p207_p3), %s614_s18, 1  ;;  %v257_v0 = vld [vmem:[%s764_s1] sm:$0xff] (!%p207_p3)  ;;  %v258_v1 = vld [vmem:[%s764_s1 + $0x8] sm:$0xff] (!%p207_p3)  ;;  %vm303_vm0 = vcmask (!%p207_p3), 261120   ;;  %v624_v3 = vmov (!%p207_p3), 0   ;;  %v271_v5 = vld [vmem:[%s765_s2 + $0x10] sm:$0xff] (!%p207_p3) }
   0x7   : > { %210 = sbr.rel (%p207_p3) target bundleno = 477 (0x1dd), region = 40  ;;  %v261_v2 = vpack.c.bf16 (!%p207_p3), %v258_v1, %v257_v0  ;;  %598 = vset.pattern.permute.xlu0 (!%p207_p3), %v624_v3  ;;  %v269_v4 = vld [vmem:[%s765_s2] sm:$0xff] (!%p207_p3)  ;;  %599 = vset.pattern.permute.xlu1 (!%p207_p3), %v624_v3  ;;  %v270_v6 = vld [vmem:[%s765_s2 + $0x8] sm:$0xff] (!%p207_p3)  ;;  %v272_v7 = vld [vmem:[%s765_s2 + $0x18] sm:$0xff] (!%p207_p3)  ;;  %vm444_vm1 = vcmask (!%p207_p3), 130048  }
   0x8   : > { %285 = vperm.xlu0 (!%p207_p3), %598, %v269_v4   ;;  %295 = vperm.xlu1 (!%p207_p3), %599, %v271_v5   ;;  %v273_v13 = vld [vmem:[%s767_s4] sm:$0xff] (!%p207_p3)  ;;  %v274_v15 = vld [vmem:[%s767_s4 + $0x8] sm:$0xff] (!%p207_p3)  ;;  %v259_v16 = vld [vmem:[%s764_s1 + $0x10] sm:$0xff] (!%p207_p3) }
   0x9   : > { %561 = vmatprep.mubr.msk.bf16.mxu0 (!%p207_p3), %vm303_vm0, %v261_v2  ;;  %v260_v17 = vld [vmem:[%s764_s1 + $0x18] sm:$0xff] (!%p207_p3)  ;;  %v275_v18 = vld [vmem:[%s767_s4 + $0x10] sm:$0xff] (!%p207_p3)  ;;  %v263_v21 = vld [vmem:[%s766_s3] sm:$0xff] (!%p207_p3) }
   0xa   : > { %v276_v19 = vld [vmem:[%s767_s4 + $0x18] sm:$0xff] (!%p207_p3)  ;;  %v262_v20 = vpack.c.bf16 (!%p207_p3), %v260_v17, %v259_v16  ;;  %v264_v22 = vld [vmem:[%s766_s3 + $0x8] sm:$0xff] (!%p207_p3)  ;;  %v265_v42 = vld [vmem:[%s766_s3 + $0x10] sm:$0xff] (!%p207_p3) }
   0xb   : > { %v267_v23 = vpack.c.bf16 (!%p207_p3), %v264_v22, %v263_v21  ;;  %v266_v43 = vld [vmem:[%s766_s3 + $0x18] sm:$0xff] (!%p207_p3) }
   0xc   : > { %290 = vperm.xlu0 (!%p207_p3), %598, %v270_v6   ;;  %300 = vperm.xlu1 (!%p207_p3), %599, %v272_v7   ;;  %v268_v44 = vpack.c.bf16 (!%p207_p3), %v266_v43, %v265_v42 }
   0xd   : > { %569 = vmatprep.mubr.msk.bf16.mxu1 (!%p207_p3), %vm303_vm0, %v267_v23 }
   0xe   : > { %s774_s18 = smov (!%p240_p4, %s614_s18), 1 }
   0xf   : > { %s547_s9 = sshll.u32 %s774_s18, 5 }
  0x10   : > { %s247_s12 = scalar_lea.vmem %s763_s0, %s547_s9  ;;  %367 = vperm.xlu0 %598, %v273_v13   ;;  %372 = vperm.xlu1 %599, %v274_v15   ;;  %s255_s15 = scalar_lea.vmem %s768_s5, %s547_s9 }
  0x11   : > { %v700_v8 = vld [vmem:[%s247_s12] sm:$0xff]  ;;  %v702_v9 = vld [vmem:[%s247_s12 + $0x8] sm:$0xff]  ;;  %v704_v10 = vld [vmem:[%s247_s12 + $0x10] sm:$0xff] }
  0x12   : > { %v281_v11 = vpack.c.bf16 %v702_v9, %v700_v8  ;;  %v708_v12 = vld [vmem:[%s247_s12 + $0x18] sm:$0xff] }
  0x13   : > { %v282_v14 = vpack.c.bf16 %v708_v12, %v704_v10 }
  0x14   : > { %557 = vmatprep.subr.bf16.mxu0 %v281_v11  ;;  %377 = vperm.xlu0 %598, %v275_v18  }
  0x15   : > { %558 = vmatpush3.bf16.msra.mxu0 %v281_v11  ;;  %382 = vperm.xlu1 %599, %v276_v19  }
  0x16   : > { %559 = vmatprep.subr.bf16.mxu0 %v282_v14 }
  0x19   : > { %560 = vmatpush3.bf16.msra.mxu0 %v282_v14 }
  0x1c   : > { %562 = vmatmul.mubr.msk.bf16.vlgmr.msra.gmra.mrb[0].mxu0 %vm303_vm0, %v262_v20 }
  0x87   : > { %v296_v24 = vpop.permute.xlu1 %295  ;;  %v286_v25 = vpop.permute.xlu0 %285 }
  0x8b   : > { %v301_v29 = vpop.permute.xlu1 %300  ;;  %v291_v32 = vpop.permute.xlu0 %290 }
  0x8f   : > { %v368_v45 = vpop.permute.xlu0 %367  ;;  %v373_v46 = vpop.permute.xlu1 %372 }
  0x93   : > { %v378_v47 = vpop.permute.xlu0 %377 }
  0x94   : > { %v383_v51 = vpop.permute.xlu1 %382 }
  0xef   : > { %v563_v26 = vpop.f32.mrb[0].mxu0 }
  0xf0   : > { %v353_v27 = vadd.f32 %v563_v26, %v296_v24  ;;  %v344_v28 = vpop.f32.mrb[1].mxu0 }
  0xf1   : > { %v345_v30 = vadd.f32 %v344_v28, %v286_v25  ;;  %v564_v31 = vpop.f32.mrb[2].mxu0 }
  0xf2   : > { %v356_v33 = vadd.f32 %v564_v31, %v301_v29  ;;  %v347_v34 = vpop.f32.mrb[3].mxu0  ;;  %v361_v36 = vmax.f32 %v353_v27, 0.0 }
  0xf3   : > { %v348_v35 = vadd.f32 %v347_v34, %v291_v32  ;;  %v359_v38 = vmax.f32 %v345_v30, 0.0 }
  0xf4   : > { %v362_v37 = vmax.f32 %v356_v33, 0.0 }
  0xf5   : > { %v360_v39 = vmax.f32 %v348_v35, 0.0 }
  0xf6   : > { %v364_v40 = vpack.c.bf16 %v362_v37, %v361_v36 }
  0xf7   : > { %v363_v41 = vpack.c.bf16 %v360_v39, %v359_v38 }
  0xf9   : > { %565 = vmatprep.subr.bf16.mxu1 %v363_v41 }
  0xfa   : > { %566 = vmatpush3.bf16.msra.mxu1 %v363_v41 }
  0xfb   : > { %567 = vmatprep.subr.bf16.mxu1 %v364_v40 }
  0xfe   : > { %568 = vmatpush3.bf16.msra.mxu1 %v364_v40 }
 0x101   : > { %570 = vmatmul.mubr.msk.bf16.vlgmr.msra.gmra.mrb[0].mxu1 %vm303_vm0, %v268_v44 }
 0x1d4   : > { %v571_v48 = vpop.f32.mrb[0].mxu1 }
 0x1d5   : > { %v434_v49 = vadd.f32 %v571_v48, %v378_v47  ;;  %v425_v50 = vpop.f32.mrb[1].mxu1 }
 0x1d6   : > { %v426_v52 = vadd.f32 %v425_v50, %v368_v45  ;;  %v572_v53 = vpop.f32.mrb[2].mxu1 }
 0x1d7   : > { %v442_v54 = vadd.f32 %v434_v49, %v704_v10  ;;  %v437_v55 = vadd.f32 %v572_v53, %v383_v51  ;;  %v428_v56 = vpop.f32.mrb[3].mxu1 }
 0x1d8   : > { %v440_v57 = vadd.f32 %v426_v52, %v700_v8  ;;  %v429_v58 = vadd.f32 %v428_v56, %v373_v46 }
 0x1d9   : > { %447 = vst.msk [vmem:[%s255_s15 + $0x10] sm:$0xff] %vm444_vm1, %v442_v54  ;;  %v443_v59 = vadd.f32 %v437_v55, %v708_v12 }
 0x1da   : > { %445 = vst.msk [vmem:[%s255_s15] sm:$0xff] %vm444_vm1, %v440_v57  ;;  %v441_v60 = vadd.f32 %v429_v58, %v702_v9 }
 0x1db   : > { %448 = vst.msk [vmem:[%s255_s15 + $0x18] sm:$0xff] %vm444_vm1, %v443_v59 }
 0x1dc   : > { %446 = vst.msk [vmem:[%s255_s15 + $0x8] sm:$0xff] %vm444_vm1, %v441_v60 }
 0x1dd PF: > { %s15_s20 = sadd.s32 1, %s622_s20   ;;  %s769_s18 = smov %s618_s19 }
 0x1de   : > { %p12_p5 = scmp.ge.s32.totalorder %s15_s20, 4   ;;  %s770_s19 = smov %s772_s21 }
 0x1e0   :  { %14 = sbr.rel (!%p12_p5) target bundleno = 2 (0x2), region = 70 }

</bundles_post_ra>
